<compile_context>
chip_gen: v5e
topology: v5e:2x2
jax: 0.10.0
libtpu: 0.0.40
codegen_flags: <defaults>
</compile_context>

<pallas_src>
import jax
import jax.numpy as jnp
from jax.experimental import pallas as pl
from jax.experimental.pallas import tpu as pltpu

PATCH_H = 10
PATCH_W = 10
IN_DIM = PATCH_H * PATCH_W * 3      # 300
HID_DIM = PATCH_H * PATCH_W         # 100

IN_PAD = 384                        # 300 -> next multiple of 128 (in-kernel only)
HID_PAD = 128                       # 100 -> next multiple of 128
DEFAULT_TILE_B = 2048               # rows per grid step (capped adaptively below)


def _round_up(x, m):
    return ((x + m - 1) // m) * m


def _cdiv(a, b):
    return -(-a // b)


def _autoencoder_kernel(x_ref,
                        w1_ref, b1_ref,
                        w2_ref, b2_ref,
                        w3_ref, b3_ref,
                        w4_ref, b4_ref,
                        o_ref,
                        xpad_ref):
    # x_ref: (tile_b, 300) f32.  Weights bf16 (in_pad, out_pad), biases f32
    # (1, out_pad).  Matmuls accumulate in f32 on the MXU; bias add and
    # activations run in f32 on the VPU/EUP.
    tile_b = x_ref.shape[0]

    # Zero the padding lanes (cols 300..383) and copy the 300 valid f32 columns
    # into the lane-aligned scratch.  This keeps the first matmul's contraction
    # dim 128-aligned with exactly-zero padding (no reliance on masked-K matmul)
    # at the cost of a tiny VMEM round trip.  Both regions are rewritten every
    # grid step, so there is no cross-step (or cross-core) state.
    xpad_ref[:, pl.ds(IN_DIM, IN_PAD - IN_DIM)] = jnp.zeros(
        (tile_b, IN_PAD - IN_DIM), dtype=xpad_ref.dtype)
    xpad_ref[:, pl.ds(0, IN_DIM)] = x_ref[...]

    x = xpad_ref[...].astype(jnp.bfloat16)                       # (tile_b, 384)

    h = jnp.tanh(jnp.dot(x, w1_ref[...],
                         preferred_element_type=jnp.float32) + b1_ref[...])
    h = jnp.tanh(jnp.dot(h.astype(jnp.bfloat16), w2_ref[...],
                         preferred_element_type=jnp.float32) + b2_ref[...])
    h = jnp.tanh(jnp.dot(h.astype(jnp.bfloat16), w3_ref[...],
                         preferred_element_type=jnp.float32) + b3_ref[...])
    y = jnp.dot(h.astype(jnp.bfloat16), w4_ref[...],
                preferred_element_type=jnp.float32) + b4_ref[...]  # (tile_b, 384)

    # Drop the zero-padded output lanes before the (masked) 300-wide store.
    o_ref[...] = jax.nn.sigmoid(y[:, :IN_DIM]).astype(o_ref.dtype)


def _pad_weight(w, in_pad, out_pad):
    fan_in, fan_out = w.shape
    return jnp.pad(w.astype(jnp.bfloat16),
                   ((0, in_pad - fan_in), (0, out_pad - fan_out)))


def _pad_bias(b, out_pad):
    return jnp.pad(b.astype(jnp.float32),
                   (0, out_pad - b.shape[0])).reshape(1, out_pad)


def autoencoder_forward(x, params, *, tile_b=DEFAULT_TILE_B):
    """x: (N, 300) float32.  params: dict of transposed (in, out) weights + biases."""
    n, f = x.shape
    assert f == IN_DIM, f"expected feature dim {IN_DIM}, got {f}"

    # Batch tile: multiple of 8 sublanes, <= padded batch, and small enough to
    # give >= 2 grid steps where possible (v7x megacore needs >= 2 to use both
    # TensorCores).  VMEM per core at tile_b=2048 is ~20 MiB (< 48 MiB limit).
    tile_b = max(8, min(tile_b, _round_up(n, 8), _round_up(_cdiv(n, 2), 8)))
    grid_b = _cdiv(n, tile_b)   # ragged final block handled by Pallas masking

    # Weights/biases are tiny: pad once per call to lane-aligned shapes so every
    # matmul contraction / hidden activation is 128-lane dense.  Padded hidden
    # lanes stay exactly 0 through tanh(0)=0; padded output lanes are sliced off
    # inside the kernel before the store.
    w1 = _pad_weight(params["w1"], IN_PAD, HID_PAD)
    w2 = _pad_weight(params["w2"], HID_PAD, HID_PAD)
    w3 = _pad_weight(params["w3"], HID_PAD, HID_PAD)
    w4 = _pad_weight(params["w4"], HID_PAD, IN_PAD)
    b1 = _pad_bias(params["b1"], HID_PAD)
    b2 = _pad_bias(params["b2"], HID_PAD)
    b3 = _pad_bias(params["b3"], HID_PAD)
    b4 = _pad_bias(params["b4"], IN_PAD)

    def batch_map(i):
        return (i, 0)

    def resident_map(i):
        return (0, 0)

    in_specs = [
        pl.BlockSpec((tile_b, IN_DIM), batch_map),             # x tile (raw f32)
        pl.BlockSpec((IN_PAD, HID_PAD), resident_map),         # w1
        pl.BlockSpec((1, HID_PAD), resident_map),              # b1
        pl.BlockSpec((HID_PAD, HID_PAD), resident_map),        # w2
        pl.BlockSpec((1, HID_PAD), resident_map),              # b2
        pl.BlockSpec((HID_PAD, HID_PAD), resident_map),        # w3
        pl.BlockSpec((1, HID_PAD), resident_map),              # b3
        pl.BlockSpec((HID_PAD, IN_PAD), resident_map),         # w4
        pl.BlockSpec((1, IN_PAD), resident_map),               # b4
    ]
    out_spec = pl.BlockSpec((tile_b, IN_DIM), batch_map)

    # Advisory cost of the real (unpadded) math / traffic for XLA's scheduler.
    flops = 2 * n * (IN_DIM * HID_DIM + HID_DIM * HID_DIM
                     + HID_DIM * HID_DIM + HID_DIM * IN_DIM)
    transcendentals = n * (3 * HID_DIM + IN_DIM)
    weight_bytes = sum(int(w.size) * 2 for w in (w1, w2, w3, w4)) \
        + sum(int(b.size) * 4 for b in (b1, b2, b3, b4))
    bytes_accessed = n * IN_DIM * 4 + n * IN_DIM * 4 + weight_bytes

    out = pl.pallas_call(
        _autoencoder_kernel,
        grid=(grid_b,),
        in_specs=in_specs,
        out_specs=out_spec,
        out_shape=jax.ShapeDtypeStruct((n, IN_DIM), jnp.float32),
        scratch_shapes=[pltpu.VMEM((tile_b, IN_PAD), jnp.float32)],
        compiler_params=pltpu.CompilerParams(
            dimension_semantics=("parallel",),      # v7x: shard batch over 2 TCs
            vmem_limit_bytes=48 * 1024 * 1024,      # < v7x 64 MiB physical VMEM
        ),
        cost_estimate=pl.CostEstimate(
            flops=flops,
            transcendentals=transcendentals,
            bytes_accessed=bytes_accessed,
        ),
    )(x, w1, b1, w2, b2, w3, b3, w4, b4)

    return out   # exactly (n, 300) f32 -- no post-kernel slicing


def init_params(key):
    """PyTorch nn.Linear default init U(-1/sqrt(fan_in), 1/sqrt(fan_in)).

    Weights stored transposed: shape (in_features, out_features)."""
    dims = [(IN_DIM, HID_DIM), (HID_DIM, HID_DIM),
            (HID_DIM, HID_DIM), (HID_DIM, IN_DIM)]
    params = {}
    for i, (fan_in, fan_out) in enumerate(dims, start=1):
        key, kw, kb = jax.random.split(key, 3)
        bound = 1.0 / jnp.sqrt(fan_in)
        params[f"w{i}"] = jax.random.uniform(
            kw, (fan_in, fan_out), jnp.float32, -bound, bound)
        params[f"b{i}"] = jax.random.uniform(
            kb, (fan_out,), jnp.float32, -bound, bound)
    return params


def reference_forward(x, params):
    """Pure-JAX f32 reference (same math) for the correctness check."""
    h = jnp.tanh(x @ params["w1"] + params["b1"])
    h = jnp.tanh(h @ params["w2"] + params["b2"])
    h = jnp.tanh(h @ params["w3"] + params["b3"])
    return jax.nn.sigmoid(h @ params["w4"] + params["b4"])


if __name__ == "__main__":
    key = jax.random.PRNGKey(0)
    key, kx = jax.random.split(key)

    batch = 8
    x = jax.random.normal(kx, (batch, IN_DIM), dtype=jnp.float32)
    params = init_params(key)

    out = autoencoder_forward(x, params)
    out = jax.block_until_ready(out)

    ref = reference_forward(x, params)
    assert out.shape == (batch, IN_DIM)
    # bf16 MXU operands with f32 accumulation vs. pure-f32 reference.
    max_err = float(jnp.max(jnp.abs(out - ref)))
    assert max_err < 3e-2, f"mismatch vs reference (max abs err {max_err})"

    print("KERNEL_OK")
</pallas_src>

<mosaic_0001>
module attributes {stable_mosaic.version = 11 : i64} {
  func.func @_autoencoder_kernel(%arg0: i32, %arg1: memref<8x300xf32, #tpu.memory_space<vmem>>, %arg2: memref<384x128xbf16, #tpu.memory_space<vmem>>, %arg3: memref<1x128xf32, #tpu.memory_space<vmem>>, %arg4: memref<128x128xbf16, #tpu.memory_space<vmem>>, %arg5: memref<1x128xf32, #tpu.memory_space<vmem>>, %arg6: memref<128x128xbf16, #tpu.memory_space<vmem>>, %arg7: memref<1x128xf32, #tpu.memory_space<vmem>>, %arg8: memref<128x384xbf16, #tpu.memory_space<vmem>>, %arg9: memref<1x384xf32, #tpu.memory_space<vmem>>, %arg10: memref<8x300xf32, #tpu.memory_space<vmem>>, %arg11: memref<8x384xf32, #tpu.memory_space<vmem>>) attributes {dimension_semantics = [#tpu.dimension_semantics<parallel>], iteration_bounds = array<i64: 1>, scalar_prefetch = 0 : i64, scratch_operands = 1 : i64, tpu.core_type = #tpu.core_type<tc>, window_params = [{transform_indices = @transform_0, window_bounds = array<i64: 8, 300>}, {pipeline_mode = #tpu.pipeline_mode<synchronous>, transform_indices = @transform_1, window_bounds = array<i64: 384, 128>}, {pipeline_mode = #tpu.pipeline_mode<synchronous>, transform_indices = @transform_2, window_bounds = array<i64: 1, 128>}, {pipeline_mode = #tpu.pipeline_mode<synchronous>, transform_indices = @transform_3, window_bounds = array<i64: 128, 128>}, {pipeline_mode = #tpu.pipeline_mode<synchronous>, transform_indices = @transform_4, window_bounds = array<i64: 1, 128>}, {pipeline_mode = #tpu.pipeline_mode<synchronous>, transform_indices = @transform_5, window_bounds = array<i64: 128, 128>}, {pipeline_mode = #tpu.pipeline_mode<synchronous>, transform_indices = @transform_6, window_bounds = array<i64: 1, 128>}, {pipeline_mode = #tpu.pipeline_mode<synchronous>, transform_indices = @transform_7, window_bounds = array<i64: 128, 384>}, {pipeline_mode = #tpu.pipeline_mode<synchronous>, transform_indices = @transform_8, window_bounds = array<i64: 1, 384>}, {transform_indices = @transform_9, window_bounds = array<i64: 8, 300>}]} {
    %cst = arith.constant 0.000000e+00 : f32
    %0 = vector.broadcast %cst : f32 to vector<8x84xf32>
    %c0 = arith.constant 0 : index
    %c300 = arith.constant 300 : index
    %1 = vector.load %arg11[%c0, %c300] : memref<8x384xf32, #tpu.memory_space<vmem>>, vector<8x84xf32>
    tpu.vector_store %arg11[%c0, %c300], %0 {strides = array<i32>} : memref<8x384xf32, #tpu.memory_space<vmem>>, vector<8x84xf32>,
    %c0_0 = arith.constant 0 : index
    %c0_1 = arith.constant 0 : index
    %2 = vector.load %arg1[%c0_0, %c0_1] : memref<8x300xf32, #tpu.memory_space<vmem>>, vector<8x300xf32>
    %c0_2 = arith.constant 0 : index
    %c0_3 = arith.constant 0 : index
    %3 = vector.load %arg11[%c0_2, %c0_3] : memref<8x384xf32, #tpu.memory_space<vmem>>, vector<8x300xf32>
    tpu.vector_store %arg11[%c0_2, %c0_3], %2 {strides = array<i32>} : memref<8x384xf32, #tpu.memory_space<vmem>>, vector<8x300xf32>,
    %c0_4 = arith.constant 0 : index
    %c0_5 = arith.constant 0 : index
    %4 = vector.load %arg11[%c0_4, %c0_5] : memref<8x384xf32, #tpu.memory_space<vmem>>, vector<8x384xf32>
    %5 = arith.truncf %4 : vector<8x384xf32> to vector<8x384xbf16>
    %c0_6 = arith.constant 0 : index
    %c0_7 = arith.constant 0 : index
    %6 = vector.load %arg2[%c0_6, %c0_7] : memref<384x128xbf16, #tpu.memory_space<vmem>>, vector<384x128xbf16>
    %cst_8 = arith.constant dense<0.000000e+00> : vector<8x128xf32>
    %7 = tpu.matmul %5, %6, %cst_8 {dimension_numbers = #tpu.dot_dimension_numbers<[1], [0], [0], [1], [0, 0, 1, 1], [], []>} : vector<8x384xbf16>, vector<384x128xbf16>, vector<8x128xf32> -> vector<8x128xf32>
    %c0_9 = arith.constant 0 : index
    %c0_10 = arith.constant 0 : index
    %8 = vector.load %arg3[%c0_9, %c0_10] : memref<1x128xf32, #tpu.memory_space<vmem>>, vector<1x128xf32>
    %9 = vector.broadcast %8 : vector<1x128xf32> to vector<8x128xf32>
    %10 = arith.addf %7, %9 : vector<8x128xf32>
    %11 = math.tanh %10 : vector<8x128xf32>
    %12 = arith.truncf %11 : vector<8x128xf32> to vector<8x128xbf16>
    %c0_11 = arith.constant 0 : index
    %c0_12 = arith.constant 0 : index
    %13 = vector.load %arg4[%c0_11, %c0_12] : memref<128x128xbf16, #tpu.memory_space<vmem>>, vector<128x128xbf16>
    %cst_13 = arith.constant dense<0.000000e+00> : vector<8x128xf32>
    %14 = tpu.matmul %12, %13, %cst_13 {dimension_numbers = #tpu.dot_dimension_numbers<[1], [0], [0], [1], [0, 0, 1, 1], [], []>} : vector<8x128xbf16>, vector<128x128xbf16>, vector<8x128xf32> -> vector<8x128xf32>
    %c0_14 = arith.constant 0 : index
    %c0_15 = arith.constant 0 : index
    %15 = vector.load %arg5[%c0_14, %c0_15] : memref<1x128xf32, #tpu.memory_space<vmem>>, vector<1x128xf32>
    %16 = vector.broadcast %15 : vector<1x128xf32> to vector<8x128xf32>
    %17 = arith.addf %14, %16 : vector<8x128xf32>
    %18 = math.tanh %17 : vector<8x128xf32>
    %19 = arith.truncf %18 : vector<8x128xf32> to vector<8x128xbf16>
    %c0_16 = arith.constant 0 : index
    %c0_17 = arith.constant 0 : index
    %20 = vector.load %arg6[%c0_16, %c0_17] : memref<128x128xbf16, #tpu.memory_space<vmem>>, vector<128x128xbf16>
    %cst_18 = arith.constant dense<0.000000e+00> : vector<8x128xf32>
    %21 = tpu.matmul %19, %20, %cst_18 {dimension_numbers = #tpu.dot_dimension_numbers<[1], [0], [0], [1], [0, 0, 1, 1], [], []>} : vector<8x128xbf16>, vector<128x128xbf16>, vector<8x128xf32> -> vector<8x128xf32>
    %c0_19 = arith.constant 0 : index
    %c0_20 = arith.constant 0 : index
    %22 = vector.load %arg7[%c0_19, %c0_20] : memref<1x128xf32, #tpu.memory_space<vmem>>, vector<1x128xf32>
    %23 = vector.broadcast %22 : vector<1x128xf32> to vector<8x128xf32>
    %24 = arith.addf %21, %23 : vector<8x128xf32>
    %25 = math.tanh %24 : vector<8x128xf32>
    %26 = arith.truncf %25 : vector<8x128xf32> to vector<8x128xbf16>
    %c0_21 = arith.constant 0 : index
    %c0_22 = arith.constant 0 : index
    %27 = vector.load %arg8[%c0_21, %c0_22] : memref<128x384xbf16, #tpu.memory_space<vmem>>, vector<128x384xbf16>
    %cst_23 = arith.constant dense<0.000000e+00> : vector<8x384xf32>
    %28 = tpu.matmul %26, %27, %cst_23 {dimension_numbers = #tpu.dot_dimension_numbers<[1], [0], [0], [1], [0, 0, 1, 1], [], []>} : vector<8x128xbf16>, vector<128x384xbf16>, vector<8x384xf32> -> vector<8x384xf32>
    %c0_24 = arith.constant 0 : index
    %c0_25 = arith.constant 0 : index
    %29 = vector.load %arg9[%c0_24, %c0_25] : memref<1x384xf32, #tpu.memory_space<vmem>>, vector<1x384xf32>
    %30 = vector.broadcast %29 : vector<1x384xf32> to vector<8x384xf32>
    %31 = arith.addf %28, %30 : vector<8x384xf32>
    %32 = vector.extract_strided_slice %31 {offsets = [0, 0], sizes = [8, 300], strides = [1, 1]} : vector<8x384xf32> to vector<8x300xf32>
    %33 = arith.negf %32 : vector<8x300xf32>
    %34 = math.exp %33 : vector<8x300xf32>
    %cst_26 = arith.constant 1.000000e+00 : f32
    %35 = vector.broadcast %cst_26 : f32 to vector<8x300xf32>
    %36 = arith.addf %35, %34 : vector<8x300xf32>
    %37 = arith.divf %35, %36 : vector<8x300xf32>
    %c0_27 = arith.constant 0 : index
    %c0_28 = arith.constant 0 : index
    %38 = vector.load %arg10[%c0_27, %c0_28] : memref<8x300xf32, #tpu.memory_space<vmem>>, vector<8x300xf32>
    tpu.vector_store %arg10[%c0_27, %c0_28], %37 {strides = array<i32>} : memref<8x300xf32, #tpu.memory_space<vmem>>, vector<8x300xf32>,
    return
  }
  func.func @transform_0(%arg0: i32) -> (i32, i32) {
    %c0_i32 = arith.constant 0 : i32
    %c0_i32_0 = arith.constant 0 : i32
    return %arg0, %c0_i32 : i32, i32
  }
  func.func @transform_1(%arg0: i32) -> (i32, i32) {
    %c0_i32 = arith.constant 0 : i32
    %c0_i32_0 = arith.constant 0 : i32
    %c0_i32_1 = arith.constant 0 : i32
    return %c0_i32, %c0_i32_0 : i32, i32
  }
  func.func @transform_2(%arg0: i32) -> (i32, i32) {
    %c0_i32 = arith.constant 0 : i32
    %c0_i32_0 = arith.constant 0 : i32
    %c0_i32_1 = arith.constant 0 : i32
    return %c0_i32, %c0_i32_0 : i32, i32
  }
  func.func @transform_3(%arg0: i32) -> (i32, i32) {
    %c0_i32 = arith.constant 0 : i32
    %c0_i32_0 = arith.constant 0 : i32
    %c0_i32_1 = arith.constant 0 : i32
    return %c0_i32, %c0_i32_0 : i32, i32
  }
  func.func @transform_4(%arg0: i32) -> (i32, i32) {
    %c0_i32 = arith.constant 0 : i32
    %c0_i32_0 = arith.constant 0 : i32
    %c0_i32_1 = arith.constant 0 : i32
    return %c0_i32, %c0_i32_0 : i32, i32
  }
  func.func @transform_5(%arg0: i32) -> (i32, i32) {
    %c0_i32 = arith.constant 0 : i32
    %c0_i32_0 = arith.constant 0 : i32
    %c0_i32_1 = arith.constant 0 : i32
    return %c0_i32, %c0_i32_0 : i32, i32
  }
  func.func @transform_6(%arg0: i32) -> (i32, i32) {
    %c0_i32 = arith.constant 0 : i32
    %c0_i32_0 = arith.constant 0 : i32
    %c0_i32_1 = arith.constant 0 : i32
    return %c0_i32, %c0_i32_0 : i32, i32
  }
  func.func @transform_7(%arg0: i32) -> (i32, i32) {
    %c0_i32 = arith.constant 0 : i32
    %c0_i32_0 = arith.constant 0 : i32
    %c0_i32_1 = arith.constant 0 : i32
    return %c0_i32, %c0_i32_0 : i32, i32
  }
  func.func @transform_8(%arg0: i32) -> (i32, i32) {
    %c0_i32 = arith.constant 0 : i32
    %c0_i32_0 = arith.constant 0 : i32
    %c0_i32_1 = arith.constant 0 : i32
    return %c0_i32, %c0_i32_0 : i32, i32
  }
  func.func @transform_9(%arg0: i32) -> (i32, i32) {
    %c0_i32 = arith.constant 0 : i32
    %c0_i32_0 = arith.constant 0 : i32
    return %arg0, %c0_i32 : i32, i32
  }
}

</mosaic_0001>

<bundles_post_ra>
// kernel: tpu_custom_call.1
= control target key start
LH: loop header
LB: loop body
LE: loop exit
PB: predicated region body
PF: predicated region fallthrough
CT: control target
= control target key end

     0   :  { %14 = vsyncpa [#allocation4], 0  ;;  %s1456_s0 = inlined_call_operand.hbm [shape: f32[8,300], index: 0, kind: input, shape index: {}]   ;;  %s1457_s1 = inlined_call_operand.hbm [shape: bf16[384,128], index: 1, kind: input, shape index: {}]   ;;  %s1458_s2 = inlined_call_operand.vmem [shape: f32[1,128], index: 2, kind: input, shape index: {}]   ;;  %s1459_s3 = inlined_call_operand.hbm [shape: bf16[128,128], index: 3, kind: input, shape index: {}]   ;;  %s1460_s4 = inlined_call_operand.vmem [shape: f32[1,128], index: 4, kind: input, shape index: {}]   ;;  %s1461_s5 = inlined_call_operand.hbm [shape: bf16[128,128], index: 5, kind: input, shape index: {}]   ;;  %s1462_s6 = inlined_call_operand.hbm [shape: f32[1,128], index: 6, kind: input, shape index: {}]   ;;  %s1463_s7 = inlined_call_operand.hbm [shape: bf16[128,384], index: 7, kind: input, shape index: {}]   ;;  %s1464_s8 = inlined_call_operand.vmem [shape: f32[1,384], index: 8, kind: input, shape index: {}]   ;;  %s1465_s9 = inlined_call_operand.hbm [shape: f32[8,300], index: 9, kind: output, shape index: {}]  }
   0x1   :  { %15 = vsyncpa [#allocation7], 0 }
   0x2   :  { %16 = vsyncpa [#allocation10], 0 }
   0x3   :  { %17 = vsyncpa [#allocation13], 0  ;;  %s34_s11 = sshll.u32 %s1457_s1, 4  ;;  %s35_s11 = int_to_ptr.hbm [resolvable:$true] %s34_s11 }
   0x4   :  { %18 = vsyncpa [#allocation5], 0  ;;  %s1362_s12 = smov [#allocation6]   ;;  %s64_s16 = sshll.u32 %s1461_s5, 4  ;;  %s65_s16 = int_to_ptr.hbm [resolvable:$true] %s64_s16 }
   0x5   :  { %s36_s13 = sshll.u32 %s1362_s12, 4  ;;  %s1363_s17 = smov 64   ;;  %s37_s13 = int_to_ptr.vmem [resolvable:$true] %s36_s13 }
   0x6   :  { %s1364_s18 = smov 4   ;;  %s1365_s19 = smov [#allocation9]  }
   0x7   :  { %42 = dma.hbm_to_vmem [thread:$0]  %s35_s11, 3072, %s37_s13, [#allocation7], %s1363_s17, %s1363_s17, %s1364_s18  }
   0x8   :  { %s66_s20 = sshll.u32 %s1365_s19, 4  ;;  %s24_s23 = sshll.u32 %s1456_s0, 4  ;;  %s67_s20 = int_to_ptr.vmem [resolvable:$true] %s66_s20  ;;  %s25_s23 = int_to_ptr.hbm [resolvable:$true] %s24_s23 }
   0x9   :  { %72 = dma.hbm_to_vmem [thread:$0]  %s65_s16, 1024, %s67_s20, [#allocation10], %s1363_s17, %s1363_s17, %s1364_s18  }
   0xa   :  { %s49_s25 = sshll.u32 %s1459_s3, 4  ;;  %s1366_s26 = smov [#allocation3]   ;;  %s50_s25 = int_to_ptr.hbm [resolvable:$true] %s49_s25 }
   0xb   :  { %s26_s27 = sshll.u32 %s1366_s26, 4  ;;  %s1367_s5 = smov [#allocation8]   ;;  %s27_s27 = int_to_ptr.vmem [resolvable:$true] %s26_s27 }
   0xc   :  { %29 = dma.hbm_to_vmem [thread:$0]  %s25_s23, 384, %s27_s27, [#allocation4]  }
   0xd   :  { %s51_s28 = sshll.u32 %s1367_s5, 4  ;;  %s78_s10 = sshll.u32 %s1462_s6, 4  ;;  %s52_s28 = int_to_ptr.vmem [resolvable:$true] %s51_s28  ;;  %s79_s10 = int_to_ptr.hbm [resolvable:$true] %s78_s10 }
   0xe   :  { %57 = dma.hbm_to_vmem [thread:$0]  %s50_s25, 1024, %s52_s28, [#allocation7], %s1363_s17, %s1363_s17, %s1364_s18  }
   0xf   :  { %s88_s12 = sshll.u32 %s1463_s7, 4  ;;  %s1368_s13 = smov [#allocation11]   ;;  %s89_s12 = int_to_ptr.hbm [resolvable:$true] %s88_s12 }
  0x10   :  { %s80_s3 = sshll.u32 %s1368_s13, 4  ;;  %s1369_s14 = smov [#allocation12]   ;;  %s81_s3 = int_to_ptr.vmem [resolvable:$true] %s80_s3 }
  0x11   :  { %83 = dma.hbm_to_vmem [thread:$0]  %s79_s10, 16, %s81_s3, [#allocation10]  }
  0x12   :  { %s90_s15 = sshll.u32 %s1369_s14, 4  ;;  %s1370_s16 = smov 192   ;;  %s91_s15 = int_to_ptr.vmem [resolvable:$true] %s90_s15 }
  0x13   :  { %s1371_s19 = smov 12  }
  0x14   :  { %96 = dma.hbm_to_vmem [thread:$0]  %s89_s12, 3072, %s91_s15, [#allocation13], %s1370_s16, %s1370_s16, %s1371_s19  }
  0x15   :  { %1352 = dma.done.wait [#allocation4], 384  }
  0x16   :  { %1353 = vsyncadd [#allocation4], 4294966912 }
  0x17   :  { %1354 = dma.done.wait [#allocation7], 4096  }
  0x18   :  { %1355 = vsyncadd [#allocation7], 4294963200 }
  0x19   :  { %1356 = dma.done.wait [#allocation10], 1040  }
  0x1a   :  { %1357 = vsyncadd [#allocation10], 4294966256 }
  0x1b   :  { %1358 = dma.done.wait [#allocation13], 3072  }
  0x1c   :  { %1359 = vsyncadd [#allocation13], 4294964224  ;;  %vm123_vm0 = vcmask 1047904   ;;  %v1372_v0 = vmov 0.0   ;;  %v1094_v1 = vld [vmem:[#allocation6 + $0x38] sm:$0xff]  ;;  %v1093_v4 = vld [vmem:[#allocation6 + $0x30] sm:$0xff] }
  0x1d   :  { %124 = vst.msk [vmem:[#allocation2 + $0x10] sm:$0xff] %vm123_vm0, %v1372_v0  ;;  %v1102_v2 = vld [vmem:[#allocation6 + $0x78] sm:$0xff]  ;;  %334 = vmatpush.bf16.msra.mxu0 %v1094_v1  ;;  %v1101_v5 = vld [vmem:[#allocation6 + $0x70] sm:$0xff]  ;;  %v1092_v7 = vld [vmem:[#allocation6 + $0x28] sm:$0xff]  ;;  %vm130_vm1 = vcmask 359424   ;;  %s815_s23 = sshll.u32 %s1465_s9, 4  ;;  %s816_s23 = int_to_ptr.hbm [resolvable:$true] %s815_s23 }
  0x1e   :  { %v1110_v3 = vld [vmem:[#allocation6 + $0xb8] sm:$0xff]  ;;  %347 = vmatpush.bf16.msra.mxu1 %v1102_v2  ;;  %v1109_v6 = vld [vmem:[#allocation6 + $0xb0] sm:$0xff]  ;;  %v1100_v8 = vld [vmem:[#allocation6 + $0x68] sm:$0xff] }
  0x1f   :  { %360 = vmatpush.bf16.msra.mxu2 %v1110_v3  ;;  %v1108_v9 = vld [vmem:[#allocation6 + $0xa8] sm:$0xff]  ;;  %v127_v11 = vld [vmem:[#allocation3 + $0x10] sm:$0xff]  ;;  %v1091_v12 = vld [vmem:[#allocation6 + $0x20] sm:$0xff] }
  0x20   :  { %v125_v10 = vld [vmem:[#allocation3] sm:$0xff]  ;;  %v126_v13 = vld [vmem:[#allocation3 + $0x8] sm:$0xff]  ;;  %v1118_v14 = vld [vmem:[#allocation8 + $0x38] sm:$0xff]  ;;  %131 = vst.msk [vmem:[#allocation2 + $0x10] sm:$0xff] %vm130_vm1, %v127_v11 }
  0x21   :  { %335 = vmatpush.bf16.msra.mxu0 %v1093_v4  ;;  %v1099_v15 = vld [vmem:[#allocation6 + $0x60] sm:$0xff]  ;;  %443 = vmatpush.bf16.msra.mxu3 %v1118_v14  ;;  %v1117_v17 = vld [vmem:[#allocation8 + $0x30] sm:$0xff]  ;;  %v1090_v18 = vld [vmem:[#allocation6 + $0x18] sm:$0xff]  ;;  %v135_v33 = vpack.c.bf16 %v125_v10, %v125_v10  ;;  %v136_v34 = vpack.c.bf16 %v126_v13, %v126_v13 }
  0x22   :  { %348 = vmatpush.bf16.msra.mxu1 %v1101_v5  ;;  %v1107_v16 = vld [vmem:[#allocation6 + $0xa0] sm:$0xff]  ;;  %v1098_v19 = vld [vmem:[#allocation6 + $0x58] sm:$0xff]  ;;  %v1116_v21 = vld [vmem:[#allocation8 + $0x28] sm:$0xff] }
  0x23   :  { %361 = vmatpush.bf16.msra.mxu2 %v1109_v6  ;;  %v1106_v20 = vld [vmem:[#allocation6 + $0x98] sm:$0xff]  ;;  %v1089_v22 = vld [vmem:[#allocation6 + $0x10] sm:$0xff]  ;;  %v1115_v25 = vld [vmem:[#allocation8 + $0x20] sm:$0xff] }
  0x24   :  { %v1097_v23 = vld [vmem:[#allocation6 + $0x50] sm:$0xff]  ;;  %v1088_v26 = vld [vmem:[#allocation6 + $0x8] sm:$0xff]  ;;  %v1087_v29 = vld [vmem:[#allocation6] sm:$0xff] }
  0x25   :  { %336 = vmatpush.bf16.msra.mxu0 %v1092_v7  ;;  %444 = vmatpush.bf16.msra.mxu3 %v1117_v17  ;;  %v1105_v24 = vld [vmem:[#allocation6 + $0x90] sm:$0xff]  ;;  %v1096_v27 = vld [vmem:[#allocation6 + $0x48] sm:$0xff]  ;;  %v1095_v30 = vld [vmem:[#allocation6 + $0x40] sm:$0xff] }
  0x26   :  { %349 = vmatpush.bf16.msra.mxu1 %v1100_v8  ;;  %v1104_v28 = vld [vmem:[#allocation6 + $0x88] sm:$0xff]  ;;  %v1103_v31 = vld [vmem:[#allocation6 + $0x80] sm:$0xff]  ;;  %v1114_v36 = vld [vmem:[#allocation8 + $0x18] sm:$0xff] }
  0x27   :  { %362 = vmatpush.bf16.msra.mxu2 %v1108_v9  ;;  %v134_v32 = vld [vmem:[#allocation2 + $0x10] sm:$0xff]  ;;  %v1113_v37 = vld [vmem:[#allocation8 + $0x10] sm:$0xff]  ;;  %v1112_v38 = vld [vmem:[#allocation8 + $0x8] sm:$0xff] }
  0x28   :  { %v137_v35 = vpack.c.bf16 %v134_v32, %v134_v32  ;;  %v1111_v39 = vld [vmem:[#allocation8] sm:$0xff]  ;;  %v1126_v40 = vld [vmem:[#allocation9 + $0x38] sm:$0xff]  ;;  %v1125_v41 = vld [vmem:[#allocation9 + $0x30] sm:$0xff] }
  0x29   :  { %337 = vmatpush.bf16.msra.mxu0 %v1091_v12  ;;  %445 = vmatpush.bf16.msra.mxu3 %v1116_v21  ;;  %v1124_v42 = vld [vmem:[#allocation9 + $0x28] sm:$0xff]  ;;  %v1163_v43 = vld [vmem:[%s1458_s2] ss:$0 sm:$0xff]  ;;  %v1123_v44 = vld [vmem:[#allocation9 + $0x20] sm:$0xff] }
  0x2a   :  { %350 = vmatpush.bf16.msra.mxu1 %v1099_v15  ;;  %v1122_v48 = vld [vmem:[#allocation9 + $0x18] sm:$0xff]  ;;  %v1121_v57 = vld [vmem:[#allocation9 + $0x10] sm:$0xff]  ;;  %v1120_v58 = vld [vmem:[#allocation9 + $0x8] sm:$0xff] }
  0x2b   :  { %363 = vmatpush.bf16.msra.mxu2 %v1107_v16  ;;  %v1119_v59 = vld [vmem:[#allocation9] sm:$0xff]  ;;  %v1074_v60 = vld [vmem:[#allocation12 + $0xa8] sm:$0xf]  ;;  %v1149_v61 = vld [vmem:[#allocation12 + $0xb0] sm:$0xf0] }
  0x2c   :  { %v1148_v62 = vld [vmem:[#allocation12 + $0xac] sm:$0xf]  ;;  %v1075_v63 = vor.u32 %v1149_v61, %v1074_v60  ;;  %v1076_v0 = vld [vmem:[#allocation12 + $0xb4] sm:$0xf0]  ;;  %v1082_v1 = vld [vmem:[#allocation12 + $0xb0] sm:$0xf] }
  0x2d   :  { %338 = vmatpush.bf16.msra.mxu0 %v1090_v18  ;;  %446 = vmatpush.bf16.msra.mxu3 %v1115_v25  ;;  %v1150_v2 = vld [vmem:[#allocation12 + $0xb8] sm:$0xf0]  ;;  %v1079_v3 = vor.u32 %v1148_v62, %v1076_v0  ;;  %v1062_v5 = vld [vmem:[#allocation12 + $0x90] sm:$0xf]  ;;  %v1145_v7 = vld [vmem:[#allocation12 + $0x94] sm:$0xf] }
  0x2e   :  { %351 = vmatpush.bf16.msra.mxu1 %v1098_v19  ;;  %v1083_v4 = vor.u32 %v1150_v2, %v1082_v1  ;;  %v1146_v6 = vld [vmem:[#allocation12 + $0x98] sm:$0xf0]  ;;  %v1064_v9 = vld [vmem:[#allocation12 + $0x9c] sm:$0xf0]  ;;  %v1070_v10 = vld [vmem:[#allocation12 + $0x98] sm:$0xf] }
  0x2f   :  { %364 = vmatpush.bf16.msra.mxu2 %v1106_v20  ;;  %v1063_v8 = vor.u32 %v1146_v6, %v1062_v5  ;;  %v1147_v11 = vld [vmem:[#allocation12 + $0xa0] sm:$0xf0]  ;;  %v1067_v12 = vor.u32 %v1145_v7, %v1064_v9  ;;  %v1050_v14 = vld [vmem:[#allocation12 + $0x78] sm:$0xf]  ;;  %v1142_v16 = vld [vmem:[#allocation12 + $0x7c] sm:$0xf] }
  0x30   :  { %v1071_v13 = vor.u32 %v1147_v11, %v1070_v10  ;;  %v1143_v15 = vld [vmem:[#allocation12 + $0x80] sm:$0xf0]  ;;  %v1052_v17 = vld [vmem:[#allocation12 + $0x84] sm:$0xf0]  ;;  %v1058_v18 = vld [vmem:[#allocation12 + $0x80] sm:$0xf] }
  0x31   :  { %339 = vmatpush.bf16.msra.mxu0 %v1089_v22  ;;  %447 = vmatpush.bf16.msra.mxu3 %v1114_v36  ;;  %v1144_v19 = vld [vmem:[#allocation12 + $0x88] sm:$0xf0]  ;;  %v1051_v20 = vor.u32 %v1143_v15, %v1050_v14  ;;  %v1055_v21 = vor.u32 %v1142_v16, %v1052_v17  ;;  %v1139_v25 = vld [vmem:[#allocation12 + $0x64] sm:$0xf]  ;;  %v1026_v32 = vld [vmem:[#allocation12 + $0x48] sm:$0xf] }
  0x32   :  { %352 = vmatpush.bf16.msra.mxu1 %v1097_v23  ;;  %v1059_v22 = vor.u32 %v1144_v19, %v1058_v18  ;;  %v1038_v23 = vld [vmem:[#allocation12 + $0x60] sm:$0xf]  ;;  %v1034_v36 = vld [vmem:[#allocation12 + $0x50] sm:$0xf]  ;;  %v1004_v60 = vld [vmem:[#allocation12 + $0x24] sm:$0xf0] }
  0x33   :  { %365 = vmatpush.bf16.msra.mxu2 %v1105_v24  ;;  %v1140_v24 = vld [vmem:[#allocation12 + $0x68] sm:$0xf0]  ;;  %v1010_v61 = vld [vmem:[#allocation12 + $0x20] sm:$0xf]  ;;  %v992_v5 = vld [vmem:[#allocation12 + $0xc] sm:$0xf0] }
  0x34   :  { %v1132_v62 = vld [vmem:[#allocation12 + $0x28] sm:$0xf0]  ;;  %v990_v1 = vld [vmem:[#allocation12] sm:$0xf]  ;;  %v998_v6 = vld [vmem:[#allocation12 + $0x8] sm:$0xf] }
  0x35   :  { %340 = vmatpush.bf16.msra.mxu0 %v1088_v26  ;;  %448 = vmatpush.bf16.msra.mxu3 %v1113_v37  ;;  %v1040_v26 = vld [vmem:[#allocation12 + $0x6c] sm:$0xf0]  ;;  %v1138_v37 = vld [vmem:[#allocation12 + $0x58] sm:$0xf0]  ;;  %v1011_v0 = vor.u32 %v1132_v62, %v1010_v61  ;;  %v1128_v2 = vld [vmem:[#allocation12 + $0x8] sm:$0xf0] }
  0x36   :  { %353 = vmatpush.bf16.msra.mxu1 %v1096_v27  ;;  %v1046_v27 = vld [vmem:[#allocation12 + $0x68] sm:$0xf]  ;;  %v1129_v7 = vld [vmem:[#allocation12 + $0x10] sm:$0xf0]  ;;  %v1165_v10 = vld [vmem:[#allocation11] ss:$0 sm:$0xff] }
  0x37   :  { %366 = vmatpush.bf16.msra.mxu2 %v1104_v28  ;;  %v1141_v28 = vld [vmem:[#allocation12 + $0x70] sm:$0xf0]  ;;  %v999_v9 = vor.u32 %v1129_v7, %v998_v6  ;;  %v573_v16 = vld [vmem:[%s1464_s8] sm:$0x7]  ;;  %s1373_s8 = smov [#allocation14]  }
  0x38   :  { %v575_v17 = vperm.slane %v573_v16, 0  ;;  %s813_s20 = sshll.u32 %s1373_s8, 4  ;;  %s814_s20 = int_to_ptr.vmem [resolvable:$true] %s813_s20 }
  0x39   :  { %341 = vmatpush.bf16.msra.mxu0 %v1087_v29  ;;  %449 = vmatpush.bf16.msra.mxu3 %v1112_v38  ;;  %v1039_v29 = vor.u32 %v1140_v24, %v1038_v23 }
  0x3a   :  { %354 = vmatpush.bf16.msra.mxu1 %v1095_v30  ;;  %v1043_v30 = vor.u32 %v1139_v25, %v1040_v26 }
  0x3b   :  { %367 = vmatpush.bf16.msra.mxu2 %v1103_v31  ;;  %v1047_v31 = vor.u32 %v1141_v28, %v1046_v27 }
  0x3c   :  { %342 = vmatmul.bf16.vlgmr.msra.gmra.mxu0 %v135_v33  ;;  %v1137_v33 = vld [vmem:[#allocation12 + $0x50] sm:$0xf0] }
  0x3d   :  { %355 = vmatmul.bf16.vlgmr.msra.gmra.mxu1 %v136_v34  ;;  %450 = vmatpush.bf16.msra.mxu3 %v1111_v39  ;;  %v1136_v34 = vld [vmem:[#allocation12 + $0x4c] sm:$0xf]  ;;  %v1027_v38 = vor.u32 %v1137_v33, %v1026_v32 }
  0x3e   :  { %368 = vmatmul.bf16.vlgmr.msra.gmra.mxu2 %v137_v35  ;;  %526 = vmatpush.bf16.msrb.mxu0 %v1126_v40  ;;  %v1028_v35 = vld [vmem:[#allocation12 + $0x54] sm:$0xf0]  ;;  %v1035_v40 = vor.u32 %v1138_v37, %v1034_v36 }
  0x3f   :  { %709 = vmatpush.bf16.msrb.mxu1 %v1075_v63  ;;  %722 = vmatpush.bf16.msrb.mxu2 %v1079_v3  ;;  %v1031_v39 = vor.u32 %v1136_v34, %v1028_v35  ;;  %v1127_v3 = vld [vmem:[#allocation12 + $0x4] sm:$0xf] }
  0x41   :  { %735 = vmatpush.bf16.msrb.mxu3 %v1083_v4  ;;  %v991_v4 = vor.u32 %v1128_v2, %v990_v1 }
  0x42   :  { %527 = vmatpush.bf16.msrb.mxu0 %v1125_v41  ;;  %v1164_v41 = vld [vmem:[%s1460_s4] ss:$0 sm:$0xff] }
  0x43   :  { %710 = vmatpush.bf16.msrb.mxu1 %v1063_v8  ;;  %723 = vmatpush.bf16.msrb.mxu2 %v1067_v12  ;;  %v995_v8 = vor.u32 %v1127_v3, %v992_v5 }
  0x45   :  { %736 = vmatpush.bf16.msrb.mxu3 %v1071_v13 }
  0x46   :  { %528 = vmatpush.bf16.msrb.mxu0 %v1124_v42 }
  0x47   :  { %711 = vmatpush.bf16.msrb.mxu1 %v1051_v20  ;;  %724 = vmatpush.bf16.msrb.mxu2 %v1055_v21  ;;  %v576_v21 = vperm.slane %v573_v16, 1 }
  0x49   :  { %737 = vmatpush.bf16.msrb.mxu3 %v1059_v22  ;;  %v577_v22 = vperm.slane %v573_v16, 2 }
  0x4a   :  { %529 = vmatpush.bf16.msrb.mxu0 %v1123_v44 }
  0x4b   :  { %712 = vmatpush.bf16.msrb.mxu1 %v1039_v29  ;;  %725 = vmatpush.bf16.msrb.mxu2 %v1043_v30 }
  0x4d   :  { %738 = vmatpush.bf16.msrb.mxu3 %v1047_v31 }
  0x4e   :  { %530 = vmatpush.bf16.msrb.mxu0 %v1122_v48  ;;  %v1134_v48 = vld [vmem:[#allocation12 + $0x38] sm:$0xf0] }
  0x4f   :  { %713 = vmatpush.bf16.msrb.mxu1 %v1027_v38  ;;  %726 = vmatpush.bf16.msrb.mxu2 %v1031_v39 }
  0x51   :  { %739 = vmatpush.bf16.msrb.mxu3 %v1035_v40 }
  0x52   :  { %531 = vmatpush.bf16.msrb.mxu0 %v1121_v57  ;;  %v1131_v57 = vld [vmem:[#allocation12 + $0x20] sm:$0xf0] }
  0x56   :  { %532 = vmatpush.bf16.msrb.mxu0 %v1120_v58  ;;  %v1130_v58 = vld [vmem:[#allocation12 + $0x1c] sm:$0xf] }
  0x57   :  { %v1007_v63 = vor.u32 %v1130_v58, %v1004_v60 }
  0x5a   :  { %533 = vmatpush.bf16.msrb.mxu0 %v1119_v59 }
  0xb9   :  { %v343_v45 = vpop.f32.mrf.mxu0 }
  0xba   :  { %v356_v46 = vpop.f32.mrf.mxu1  ;;  %v344_v47 = vadd.f32 %v1163_v43, %v343_v45 }
  0xbc   :  { %v357_v49 = vadd.f32 %v356_v46, %v344_v47  ;;  %v1014_v47 = vld [vmem:[#allocation12 + $0x30] sm:$0xf] }
  0xc1   :  { %v369_v50 = vpop.f32.mrf.mxu2  ;;  %v345_v52 = vpop.f32.mrf.mxu0 }
  0xc2   :  { %v370_v51 = vadd.f32 %v369_v50, %v357_v49  ;;  %v358_v53 = vpop.f32.mrf.mxu1  ;;  %v1133_v49 = vld [vmem:[#allocation12 + $0x34] sm:$0xf]  ;;  %v1015_v50 = vor.u32 %v1134_v48, %v1014_v47  ;;  %v1022_v52 = vld [vmem:[#allocation12 + $0x38] sm:$0xf] }
  0xc3   :  { %v1135_v53 = vld [vmem:[#allocation12 + $0x40] sm:$0xf0] }
  0xc4   :  { %1166 = vtanh.f32 %v370_v51  ;;  %v1016_v51 = vld [vmem:[#allocation12 + $0x3c] sm:$0xf0]  ;;  %714 = vmatpush.bf16.msrb.mxu1 %v1015_v50 }
  0xc9   :  { %v371_v54 = vpop.f32.mrf.mxu2 }
  0xca   :  { %v1167_v55 = vpop.eup %1166  ;;  %v1019_v54 = vor.u32 %v1133_v49, %v1016_v51 }
  0xcb   :  { %v374_v56 = vpack.c.bf16 %v1167_v55, %v1167_v55  ;;  %v1023_v55 = vor.u32 %v1135_v53, %v1022_v52 }
  0xcc   :  { %727 = vmatpush.bf16.msrb.mxu2 %v1019_v54 }
  0xcd   :  { %451 = vmatmul.bf16.vlgmr.msra.gmra.mxu3 %v374_v56  ;;  %v1002_v56 = vld [vmem:[#allocation12 + $0x18] sm:$0xf] }
  0xce   :  { %740 = vmatpush.bf16.msrb.mxu3 %v1023_v55  ;;  %v1003_v59 = vor.u32 %v1131_v57, %v1002_v56 }
  0xd0   :  { %715 = vmatpush.bf16.msrb.mxu1 %v1003_v59  ;;  %728 = vmatpush.bf16.msrb.mxu2 %v1007_v63 }
  0xd2   :  { %741 = vmatpush.bf16.msrb.mxu3 %v1011_v0 }
  0xd4   :  { %716 = vmatpush.bf16.msrb.mxu1 %v991_v4  ;;  %729 = vmatpush.bf16.msrb.mxu2 %v995_v8 }
  0xd6   :  { %742 = vmatpush.bf16.msrb.mxu3 %v999_v9 }
 0x150   :  { %v452_v42 = vpop.f32.mrf.mxu3 }
 0x151   :  { %v453_v43 = vadd.f32 %v1164_v41, %v452_v42 }
 0x153   :  { %1168 = vtanh.f32 %v453_v43 }
 0x158   :  { %v454_v44 = vpop.f32.mrf.mxu3 }
 0x159   :  { %v1169_v45 = vpop.eup %1168 }
 0x15a   :  { %v457_v46 = vpack.c.bf16 %v1169_v45, %v1169_v45 }
 0x15c   :  { %534 = vmatmul.bf16.vlgmr.msrb.gmra.mxu0 %v457_v46 }
 0x1d9   :  { %v535_v11 = vpop.f32.mrf.mxu0 }
 0x1da   :  { %v536_v12 = vadd.f32 %v1165_v10, %v535_v11 }
 0x1dc   :  { %1170 = vtanh.f32 %v536_v12 }
 0x1e1   :  { %v537_v13 = vpop.f32.mrf.mxu0 }
 0x1e2   :  { %v1171_v14 = vpop.eup %1170 }
 0x1e3   :  { %v540_v15 = vpack.c.bf16 %v1171_v14, %v1171_v14 }
 0x1e5   :  { %717 = vmatmul.bf16.vlgmr.msrb.gmra.mxu1 %v540_v15  ;;  %730 = vmatmul.bf16.vlgmr.msrb.gmra.mxu2 %v540_v15 }
 0x1e6   :  { %743 = vmatmul.bf16.vlgmr.msrb.gmra.mxu3 %v540_v15 }
 0x262   :  { %v718_v18 = vpop.f32.mrf.mxu1 }
 0x263   :  { %v719_v19 = vadd.f32 %v718_v18, %v575_v17 }
 0x265   :  { %v1084_v20 = vmul.f32 -1.442695, %v719_v19 }
 0x267   :  { %1172 = vpow2.f32 %v1084_v20 }
 0x268   :  { %v731_v23 = vpop.f32.mrf.mxu2 }
 0x269   :  { %v732_v24 = vadd.f32 %v731_v23, %v576_v21  ;;  %v744_v25 = vpop.f32.mrf.mxu3 }
 0x26a   :  { %v745_v26 = vadd.f32 %v744_v25, %v577_v22  ;;  %v720_v27 = vpop.f32.mrf.mxu1 }
 0x26b   :  { %v1085_v28 = vmul.f32 -1.442695, %v732_v24 }
 0x26c   :  { %v1086_v29 = vmul.f32 -1.442695, %v745_v26 }
 0x26d   :  { %v1173_v30 = vpop.eup %1172  ;;  %1174 = vpow2.f32 %v1085_v28 }
 0x26e   :  { %v757_v31 = vadd.f32 1.0, %v1173_v30  ;;  %1176 = vpow2.f32 %v1086_v29 }
 0x270   :  { %1178 = vrcp.f32 %v757_v31  ;;  %v733_v32 = vpop.f32.mrf.mxu2  ;;  %v771_v41 = vand.u32 2147483648, %v757_v31  ;;  %v769_v43 = vand.u32 2147483647, %v757_v31  ;;  %vm765_vm3 = vweird.f32 %v757_v31 }
 0x271   :  { %v746_v33 = vpop.f32.mrf.mxu3 }
 0x272   :  { %v772_v49 = vor.u32 1.1754944e-38, %v771_v41  ;;  %vm770_vm5 = vcmp.eq.f32.partialorder %v769_v43, 8.507059e+37 }
 0x273   :  { %v1175_v34 = vpop.eup %1174 }
 0x274   :  { %v1177_v35 = vpop.eup %1176  ;;  %v758_v36 = vadd.f32 1.0, %v1175_v34 }
 0x275   :  { %v759_v37 = vadd.f32 1.0, %v1177_v35 }
 0x276   :  { %v1179_v38 = vpop.eup %1178  ;;  %1180 = vrcp.f32 %v758_v36  ;;  %v786_v54 = vand.u32 2147483648, %v758_v36  ;;  %v784_v56 = vand.u32 2147483647, %v758_v36  ;;  %vm780_vm8 = vweird.f32 %v758_v36 }
 0x277   :  { %v761_v39 = vmul.f32 %v1179_v38, %v757_v31  ;;  %1182 = vrcp.f32 %v759_v37  ;;  %vm766_vm2 = vweird.f32 %v1179_v38  ;;  %v801_v57 = vand.u32 2147483648, %v759_v37 }
 0x278   :  { %vm767_vm4 = vmor %vm765_vm3, %vm766_vm2  ;;  %v799_v59 = vand.u32 2147483647, %v759_v37  ;;  %vm795_vm9 = vweird.f32 %v759_v37  ;;  %v787_v61 = vor.u32 1.1754944e-38, %v786_v54  ;;  %vm785_vm11 = vcmp.eq.f32.partialorder %v784_v56, 8.507059e+37 }
 0x279   :  { %v762_v40 = vsub.f32 1.0, %v761_v39  ;;  %v802_v0 = vor.u32 1.1754944e-38, %v801_v57 }
 0x27a   :  { %vm800_vm13 = vcmp.eq.f32.partialorder %v799_v59, 8.507059e+37 }
 0x27b   :  { %v763_v42 = vmul.f32 %v1179_v38, %v762_v40 }
 0x27c   :  { %v1181_v44 = vpop.eup %1180 }
 0x27d   :  { %v1183_v45 = vpop.eup %1182  ;;  %v776_v46 = vmul.f32 %v1181_v44, %v758_v36  ;;  %v764_v47 = vadd.f32 %v1179_v38, %v763_v42  ;;  %vm781_vm6 = vweird.f32 %v1181_v44 }
 0x27e   :  { %v791_v48 = vmul.f32 %v1183_v45, %v759_v37  ;;  %vm796_vm7 = vweird.f32 %v1183_v45  ;;  %vm782_vm10 = vmor %vm780_vm8, %vm781_vm6 }
 0x27f   :  { %v777_v50 = vsub.f32 1.0, %v776_v46  ;;  %v768_v51 = vsel %vm767_vm4, %v1179_v38, %v764_v47  ;;  %vm797_vm12 = vmor %vm795_vm9, %vm796_vm7 }
 0x280   :  { %v792_v52 = vsub.f32 1.0, %v791_v48  ;;  %v773_v53 = vsel %vm770_vm5, %v772_v49, %v768_v51 }
 0x281   :  { %v778_v55 = vmul.f32 %v1181_v44, %v777_v50  ;;  %805 = vst [vmem:[#allocation14] sm:$0xff] %v773_v53 }
 0x282   :  { %v793_v58 = vmul.f32 %v1183_v45, %v792_v52 }
 0x283   :  { %v779_v60 = vadd.f32 %v1181_v44, %v778_v55 }
 0x284   :  { %v794_v62 = vadd.f32 %v1183_v45, %v793_v58 }
 0x285   :  { %v783_v63 = vsel %vm782_vm10, %v1181_v44, %v779_v60 }
 0x286   :  { %v788_v1 = vsel %vm785_vm11, %v787_v61, %v783_v63  ;;  %v798_v2 = vsel %vm797_vm12, %v1183_v45, %v794_v62 }
 0x287   :  { %v803_v3 = vsel %vm800_vm13, %v802_v0, %v798_v2  ;;  %806 = vst [vmem:[#allocation14 + $0x8] sm:$0xff] %v788_v1 }
 0x288   :  { %807 = vst.msk [vmem:[#allocation14 + $0x10] sm:$0xff] %vm130_vm1, %v803_v3 }
 0x289   :  { %818 = dma.vmem_to_hbm [thread:$0]  %s814_s20, 384, %s816_s23, [#allocation5]  }
 0x28a   :  { %1360 = dma.done.wait [#allocation5], 384  }
 0x28b   :  { %1361 = vsyncadd [#allocation5], 4294966912 }
 0x28c   :  { %823 = vsyncpa [#allocation4], 1 }
 0x28d   :  { %824 = vsyncpa [#allocation7], 1 }
 0x28e   :  { %825 = vsyncpa [#allocation10], 1 }
 0x28f   :  { %826 = vsyncpa [#allocation13], 1 }
 0x290   :  { %827 = vsyncpa [#allocation5], 1 }

</bundles_post_ra>
